<compile_context>
chip_gen: v5e
topology: v5e:2x2
jax: 0.10.0
libtpu: 0.0.40
codegen_flags: <defaults>
</compile_context>

<pallas_src>
import functools
from math import sqrt

import jax
import jax.numpy as jnp
from jax.experimental import pallas as pl
from jax.experimental.pallas import tpu as pltpu


def _attn_kernel(lr_ref, lc_ref, q_ref, kT_ref, v_ref, o_ref, *maybe_a_ref,
                 scale, n_real, n_var, d_model, with_attn, compute_dtype):
    # lr_ref : (1, 1, L)      int32  labels, row orientation (full length)
    # lc_ref : (1, tq, 1)     int32  labels, column orientation (query tile)
    # q_ref  : (1, v, tq, S)  f32    query tile, variate-major
    # kT_ref : (1, S, L)      f32    key summed over variates, pre-transposed
    # v_ref  : (1, v, L, S)   f32    value, variate-major, full length
    # o_ref  : (1, tq, v*S)   f32    V output, lane-packed
    # a_ref  : (1, tq, v*L)          A output (only when with_attn)
    a_ref = maybe_a_ref[0] if with_attn else None
    L = kT_ref.shape[2]
    tq = q_ref.shape[2]
    qi = pl.program_id(1)

    # ---- additive cluster-mask bias (0 attended / -inf masked), built once ---
    lab_r = lr_ref[0]                                    # (1, L)
    lab_c = lc_ref[0]                                    # (tq, 1)
    mask = lab_c == lab_r                                # (tq, L)
    if n_real < L:                                       # time_enc rows/cols attend everywhere
        row_i = jax.lax.broadcasted_iota(jnp.int32, (tq, L), 0) + qi * tq
        col_i = jax.lax.broadcasted_iota(jnp.int32, (tq, L), 1)
        mask = jnp.logical_or(mask,
                              jnp.logical_or(row_i >= n_real, col_i >= n_real))
    bias = jnp.where(mask, 0.0, -jnp.inf)                # (tq, L) f32

    kT = kT_ref[0].astype(compute_dtype)                 # (S, L)

    # ---- scores: one tall (v*tq, S) x (S, L) matmul when sublane-aligned -----
    batched = (tq % 8 == 0)
    if batched:
        q_flat = jnp.concatenate(
            [q_ref[0, kv] for kv in range(n_var)], axis=0)          # (v*tq, S)
        q_flat = (q_flat * scale).astype(compute_dtype)
        s_all = jnp.dot(q_flat, kT,
                        preferred_element_type=jnp.float32)         # (v*tq, L)

    # ---- per-variate masked softmax + value matmul, streamed to outputs ------
    for kv in range(n_var):
        if batched:
            s = s_all[kv * tq:(kv + 1) * tq, :] + bias
        else:
            q_kv = (q_ref[0, kv] * scale).astype(compute_dtype)     # (tq, S)
            s = jnp.dot(q_kv, kT, preferred_element_type=jnp.float32) + bias
        m = jnp.max(s, axis=-1, keepdims=True)
        p = jnp.exp(s - m)                                # masked entries -> 0
        inv = 1.0 / jnp.sum(p, axis=-1, keepdims=True)    # (tq, 1)
        v_kv = v_ref[0, kv].astype(compute_dtype)         # (L, S)
        o_kv = jnp.dot(p.astype(compute_dtype), v_kv,
                       preferred_element_type=jnp.float32) * inv
        o_ref[0, :, kv * d_model:(kv + 1) * d_model] = o_kv.astype(o_ref.dtype)
        if with_attn:
            a_ref[0, :, kv * L:(kv + 1) * L] = (p * inv).astype(a_ref.dtype)


def _vmem_bytes(L, tq, nv, S, with_attn):
    f = 4
    q = 2 * nv * tq * S * f                 # double-buffered q block
    o = 2 * tq * nv * S * f                 # double-buffered V output block
    a = (2 * tq * nv * L * f) if with_attn else 0
    kT = 2 * S * L * f
    v = 2 * nv * L * S * f
    work = 2 * nv * tq * L * f              # scores / probs intermediates (rough)
    return q + o + a + kT + v + work


def _choose_query_tile(L, nv, S, with_attn, budget=40 * 1024 * 1024):
    if L % 8 != 0:
        return L                            # single full-length tile (tiny L)
    cands = [t for t in range(8, L + 1, 8) if L % t == 0]
    for t in sorted(cands, reverse=True):
        if _vmem_bytes(L, t, nv, S, with_attn) <= budget:
            return t
    return min(cands) if cands else L


def clustered_attention(query, key, value, label_arr, *, scale=None,
                        output_attention=False, time_enc=0,
                        use_bf16=False, a_dtype=None):
    """query/key/value: (b, L, v, S); label_arr: (b, l); L = l (+4 if time_enc).

    Matches ClusteredAttention.forward with eval-mode dropout (identity).
    Returns (V, A) when output_attention else (V, None).
    """
    b, L, nv, S = query.shape
    l_lab = label_arr.shape[1]
    if L != l_lab + (4 if time_enc else 0):
        raise ValueError("sequence length inconsistent with label_arr/time_enc")
    scale = float(scale) if scale is not None else 1.0 / sqrt(S)
    compute_dtype = jnp.bfloat16 if use_bf16 else jnp.float32
    a_out_dtype = jnp.float32 if a_dtype is None else a_dtype

    # variate-major layouts (cheap one-off XLA transposes) + pre-reduced key
    q_t = jnp.transpose(query.astype(jnp.float32), (0, 2, 1, 3))        # (b,v,L,S)
    v_t = jnp.transpose(value.astype(jnp.float32), (0, 2, 1, 3))        # (b,v,L,S)
    kT = jnp.transpose(key.astype(jnp.float32).sum(axis=2), (0, 2, 1))  # (b,S,L)

    lab = label_arr.astype(jnp.int32)
    if L > l_lab:                  # padded positions forced attend-all in-kernel
        lab = jnp.pad(lab, ((0, 0), (0, L - l_lab)), constant_values=-1)
    lab_r = lab.reshape(b, 1, L)
    lab_c = lab.reshape(b, L, 1)

    tq = _choose_query_tile(L, nv, S, output_attention)
    n_qt = L // tq
    vmem_limit = int(min(100 * 1024 * 1024,
                         max(32 * 1024 * 1024,
                             _vmem_bytes(L, tq, nv, S, output_attention)
                             + 8 * 1024 * 1024)))

    kern = functools.partial(_attn_kernel, scale=scale, n_real=l_lab,
                             n_var=nv, d_model=S, with_attn=output_attention,
                             compute_dtype=compute_dtype)

    in_specs = [
        pl.BlockSpec((1, 1, L), lambda bi, qi: (bi, 0, 0)),            # labels row
        pl.BlockSpec((1, tq, 1), lambda bi, qi: (bi, qi, 0)),          # labels col
        pl.BlockSpec((1, nv, tq, S), lambda bi, qi: (bi, 0, qi, 0)),   # query tile
        pl.BlockSpec((1, S, L), lambda bi, qi: (bi, 0, 0)),            # sum-key^T
        pl.BlockSpec((1, nv, L, S), lambda bi, qi: (bi, 0, 0, 0)),     # value
    ]

    if output_attention:
        out_shape = (jax.ShapeDtypeStruct((b, L, nv * S), jnp.float32),
                     jax.ShapeDtypeStruct((b, L, nv * L), a_out_dtype))
        out_specs = (pl.BlockSpec((1, tq, nv * S), lambda bi, qi: (bi, qi, 0)),
                     pl.BlockSpec((1, tq, nv * L), lambda bi, qi: (bi, qi, 0)))
    else:
        out_shape = jax.ShapeDtypeStruct((b, L, nv * S), jnp.float32)
        out_specs = pl.BlockSpec((1, tq, nv * S), lambda bi, qi: (bi, qi, 0))

    res = pl.pallas_call(
        kern,
        out_shape=out_shape,
        grid=(b, n_qt),
        in_specs=in_specs,
        out_specs=out_specs,
        compiler_params=pltpu.CompilerParams(
            dimension_semantics=("parallel", "parallel"),
            vmem_limit_bytes=vmem_limit),
    )(lab_r, lab_c, q_t, kT, v_t)

    if output_attention:
        V_packed, A_packed = res
        return (V_packed.reshape(b, L, nv, S),
                A_packed.reshape(b, L, nv, L))
    return res.reshape(b, L, nv, S), None


if __name__ == "__main__":
    b, l, v, s = 2, 8, 4, 32
    rng = jax.random.PRNGKey(0)
    kq, kk, kv_, kl = jax.random.split(rng, 4)
    query = jax.random.normal(kq, (b, l, v, s), dtype=jnp.float32)
    key_ = jax.random.normal(kk, (b, l, v, s), dtype=jnp.float32)
    value = jax.random.normal(kv_, (b, l, v, s), dtype=jnp.float32)
    labels = jax.random.randint(kl, (b, l), 0, 3)

    # pure-JAX reference (mirrors the PyTorch forward, eval mode)
    def ref(q, k, val, lab, time_enc=0):
        _, L_, _, s_ = q.shape
        scl = 1.0 / sqrt(s_)
        msk = lab[:, :, None] == lab[:, None, :]
        if time_enc:
            l0 = lab.shape[1]
            msk = jnp.concatenate(
                [msk, jnp.ones((q.shape[0], 4, l0), dtype=bool)], axis=1)
            msk = jnp.concatenate(
                [msk, jnp.ones((q.shape[0], l0 + 4, 4), dtype=bool)], axis=2)
        sum_tot = k.sum(axis=2)                                   # (b, L, s)
        scores = jnp.einsum('bivd,bjd->bivj', q, sum_tot)
        scores = jnp.where(msk[:, :, None, :], scores, -jnp.inf)
        a = jax.nn.softmax(scl * scores, axis=-1)
        vo = jnp.einsum('bivj,bjvd->bivd', a, val)
        return vo, a

    # case 1: output_attention=True, time_enc=0
    V, A = clustered_attention(query, key_, value, labels,
                               output_attention=True, time_enc=0)
    V = jax.block_until_ready(V)
    A = jax.block_until_ready(A)
    V_ref, A_ref = ref(query, key_, value, labels, 0)
    assert V.shape == (b, l, v, s) and A.shape == (b, l, v, l)
    assert jnp.allclose(V, V_ref, atol=1e-4, rtol=1e-4), \
        float(jnp.max(jnp.abs(V - V_ref)))
    assert jnp.allclose(A, A_ref, atol=1e-4, rtol=1e-4), \
        float(jnp.max(jnp.abs(A - A_ref)))

    # case 2: output_attention=False (no A writeback variant)
    V2, A2 = clustered_attention(query, key_, value, labels,
                                 output_attention=False, time_enc=0)
    V2 = jax.block_until_ready(V2)
    assert A2 is None
    assert jnp.allclose(V2, V_ref, atol=1e-4, rtol=1e-4), \
        float(jnp.max(jnp.abs(V2 - V_ref)))

    # case 3: time_enc=1 (4 extra always-attended rows/cols; odd L -> fallback path)
    qe = jax.random.normal(jax.random.PRNGKey(1), (b, l + 4, v, s), jnp.float32)
    ke = jax.random.normal(jax.random.PRNGKey(2), (b, l + 4, v, s), jnp.float32)
    ve = jax.random.normal(jax.random.PRNGKey(3), (b, l + 4, v, s), jnp.float32)
    V3, A3 = clustered_attention(qe, ke, ve, labels,
                                 output_attention=True, time_enc=1)
    V3 = jax.block_until_ready(V3)
    A3 = jax.block_until_ready(A3)
    V3_ref, A3_ref = ref(qe, ke, ve, labels, 1)
    assert V3.shape == (b, l + 4, v, s) and A3.shape == (b, l + 4, v, l + 4)
    assert jnp.allclose(V3, V3_ref, atol=1e-4, rtol=1e-4), \
        float(jnp.max(jnp.abs(V3 - V3_ref)))
    assert jnp.allclose(A3, A3_ref, atol=1e-4, rtol=1e-4), \
        float(jnp.max(jnp.abs(A3 - A3_ref)))

    # case 4: bf16 MXU operands (f32 accumulation) — loose tolerance
    V4, _ = clustered_attention(query, key_, value, labels,
                                output_attention=False, time_enc=0,
                                use_bf16=True)
    V4 = jax.block_until_ready(V4)
    assert jnp.allclose(V4, V_ref, atol=0.15, rtol=0.15), \
        float(jnp.max(jnp.abs(V4 - V_ref)))

    print("KERNEL_OK")
</pallas_src>

<mosaic_0001>
module attributes {stable_mosaic.version = 11 : i64} {
  func.func @_attn_kernel(%arg0: i32, %arg1: i32, %arg2: memref<1x1x8xi32, #tpu.memory_space<vmem>>, %arg3: memref<1x8x1xi32, #tpu.memory_space<vmem>>, %arg4: memref<1x4x8x32xf32, #tpu.memory_space<vmem>>, %arg5: memref<1x32x8xf32, #tpu.memory_space<vmem>>, %arg6: memref<1x4x8x32xf32, #tpu.memory_space<vmem>>, %arg7: memref<1x8x128xf32, #tpu.memory_space<vmem>>, %arg8: memref<1x8x32xf32, #tpu.memory_space<vmem>>) attributes {dimension_semantics = [#tpu.dimension_semantics<parallel>, #tpu.dimension_semantics<parallel>], iteration_bounds = array<i64: 2, 1>, scalar_prefetch = 0 : i64, scratch_operands = 0 : i64, tpu.core_type = #tpu.core_type<tc>, window_params = [{transform_indices = @transform_0, window_bounds = array<i64: 1, 1, 8>}, {transform_indices = @transform_1, window_bounds = array<i64: 1, 8, 1>}, {transform_indices = @transform_2, window_bounds = array<i64: 1, 4, 8, 32>}, {transform_indices = @transform_3, window_bounds = array<i64: 1, 32, 8>}, {transform_indices = @transform_4, window_bounds = array<i64: 1, 4, 8, 32>}, {transform_indices = @transform_5, window_bounds = array<i64: 1, 8, 128>}, {transform_indices = @transform_6, window_bounds = array<i64: 1, 8, 32>}]} {
    %c0 = arith.constant 0 : index
    %c0_0 = arith.constant 0 : index
    %c0_1 = arith.constant 0 : index
    %0 = vector.load %arg2[%c0, %c0_0, %c0_1] : memref<1x1x8xi32, #tpu.memory_space<vmem>>, vector<1x1x8xi32>
    %1 = vector.shape_cast %0 : vector<1x1x8xi32> to vector<1x8xi32>
    %c0_2 = arith.constant 0 : index
    %c0_3 = arith.constant 0 : index
    %c0_4 = arith.constant 0 : index
    %2 = vector.load %arg3[%c0_2, %c0_3, %c0_4] : memref<1x8x1xi32, #tpu.memory_space<vmem>>, vector<1x8x1xi32>
    %3 = vector.shape_cast %2 : vector<1x8x1xi32> to vector<8x1xi32>
    %4 = vector.broadcast %3 : vector<8x1xi32> to vector<8x8xi32>
    %5 = vector.broadcast %1 : vector<1x8xi32> to vector<8x8xi32>
    %6 = arith.cmpi eq, %4, %5 : vector<8x8xi32>
    %cst = arith.constant 0.000000e+00 : f32
    %cst_5 = arith.constant 0xFF800000 : f32
    %7 = vector.broadcast %cst : f32 to vector<8x8xf32>
    %8 = vector.broadcast %cst_5 : f32 to vector<8x8xf32>
    %9 = arith.select %6, %7, %8 : vector<8x8xi1>, vector<8x8xf32>
    %c0_6 = arith.constant 0 : index
    %c0_7 = arith.constant 0 : index
    %c0_8 = arith.constant 0 : index
    %10 = vector.load %arg5[%c0_6, %c0_7, %c0_8] : memref<1x32x8xf32, #tpu.memory_space<vmem>>, vector<1x32x8xf32>
    %11 = vector.shape_cast %10 : vector<1x32x8xf32> to vector<32x8xf32>
    %c0_9 = arith.constant 0 : index
    %c0_10 = arith.constant 0 : index
    %c0_11 = arith.constant 0 : index
    %c0_12 = arith.constant 0 : index
    %12 = vector.load %arg4[%c0_9, %c0_10, %c0_11, %c0_12] : memref<1x4x8x32xf32, #tpu.memory_space<vmem>>, vector<1x1x8x32xf32>
    %13 = vector.shape_cast %12 : vector<1x1x8x32xf32> to vector<8x32xf32>
    %c0_13 = arith.constant 0 : index
    %c1 = arith.constant 1 : index
    %c0_14 = arith.constant 0 : index
    %c0_15 = arith.constant 0 : index
    %14 = vector.load %arg4[%c0_13, %c1, %c0_14, %c0_15] : memref<1x4x8x32xf32, #tpu.memory_space<vmem>>, vector<1x1x8x32xf32>
    %15 = vector.shape_cast %14 : vector<1x1x8x32xf32> to vector<8x32xf32>
    %c0_16 = arith.constant 0 : index
    %c2 = arith.constant 2 : index
    %c0_17 = arith.constant 0 : index
    %c0_18 = arith.constant 0 : index
    %16 = vector.load %arg4[%c0_16, %c2, %c0_17, %c0_18] : memref<1x4x8x32xf32, #tpu.memory_space<vmem>>, vector<1x1x8x32xf32>
    %17 = vector.shape_cast %16 : vector<1x1x8x32xf32> to vector<8x32xf32>
    %c0_19 = arith.constant 0 : index
    %c3 = arith.constant 3 : index
    %c0_20 = arith.constant 0 : index
    %c0_21 = arith.constant 0 : index
    %18 = vector.load %arg4[%c0_19, %c3, %c0_20, %c0_21] : memref<1x4x8x32xf32, #tpu.memory_space<vmem>>, vector<1x1x8x32xf32>
    %19 = vector.shape_cast %18 : vector<1x1x8x32xf32> to vector<8x32xf32>
    %20 = tpu.concatenate %13, %15, %17, %19 in 0 : vector<8x32xf32>, vector<8x32xf32>, vector<8x32xf32>, vector<8x32xf32> -> vector<32x32xf32>
    %cst_22 = arith.constant 0.176776692 : f32
    %21 = vector.broadcast %cst_22 : f32 to vector<32x32xf32>
    %22 = arith.mulf %20, %21 : vector<32x32xf32>
    %cst_23 = arith.constant dense<0.000000e+00> : vector<32x8xf32>
    %23 = tpu.matmul %22, %11, %cst_23 {dimension_numbers = #tpu.dot_dimension_numbers<[1], [0], [0], [1], [0, 0, 1, 1], [], []>} : vector<32x32xf32>, vector<32x8xf32>, vector<32x8xf32> -> vector<32x8xf32>
    %24 = vector.extract_strided_slice %23 {offsets = [0, 0], sizes = [8, 8], strides = [1, 1]} : vector<32x8xf32> to vector<8x8xf32>
    %25 = arith.addf %24, %9 : vector<8x8xf32>
    %cst_24 = arith.constant dense<0xFF800000> : vector<8xf32>
    %26 = vector.multi_reduction <maximumf>, %25, %cst_24 [1] : vector<8x8xf32> to vector<8xf32>
    %27 = vector.shape_cast %26 : vector<8xf32> to vector<8x1xf32>
    %28 = vector.broadcast %27 : vector<8x1xf32> to vector<8x8xf32>
    %29 = arith.subf %25, %28 : vector<8x8xf32>
    %30 = math.exp %29 : vector<8x8xf32>
    %cst_25 = arith.constant dense<0.000000e+00> : vector<8xf32>
    %31 = vector.multi_reduction <add>, %30, %cst_25 [1] : vector<8x8xf32> to vector<8xf32>
    %32 = vector.shape_cast %31 : vector<8xf32> to vector<8x1xf32>
    %cst_26 = arith.constant 1.000000e+00 : f32
    %33 = vector.broadcast %cst_26 : f32 to vector<8x1xf32>
    %34 = arith.divf %33, %32 : vector<8x1xf32>
    %c0_27 = arith.constant 0 : index
    %c0_28 = arith.constant 0 : index
    %c0_29 = arith.constant 0 : index
    %c0_30 = arith.constant 0 : index
    %35 = vector.load %arg6[%c0_27, %c0_28, %c0_29, %c0_30] : memref<1x4x8x32xf32, #tpu.memory_space<vmem>>, vector<1x1x8x32xf32>
    %36 = vector.shape_cast %35 : vector<1x1x8x32xf32> to vector<8x32xf32>
    %cst_31 = arith.constant dense<0.000000e+00> : vector<8x32xf32>
    %37 = tpu.matmul %30, %36, %cst_31 {dimension_numbers = #tpu.dot_dimension_numbers<[1], [0], [0], [1], [0, 0, 1, 1], [], []>} : vector<8x8xf32>, vector<8x32xf32>, vector<8x32xf32> -> vector<8x32xf32>
    %38 = vector.broadcast %34 : vector<8x1xf32> to vector<8x32xf32>
    %39 = arith.mulf %37, %38 : vector<8x32xf32>
    %c0_32 = arith.constant 0 : index
    %c0_33 = arith.constant 0 : index
    %c0_34 = arith.constant 0 : index
    %40 = vector.load %arg7[%c0_32, %c0_33, %c0_34] : memref<1x8x128xf32, #tpu.memory_space<vmem>>, vector<1x8x32xf32>
    %41 = vector.shape_cast %40 : vector<1x8x32xf32> to vector<8x32xf32>
    %42 = vector.shape_cast %39 : vector<8x32xf32> to vector<1x8x32xf32>
    tpu.vector_store %arg7[%c0_32, %c0_33, %c0_34], %42 {strides = array<i32>} : memref<1x8x128xf32, #tpu.memory_space<vmem>>, vector<1x8x32xf32>,
    %43 = vector.broadcast %34 : vector<8x1xf32> to vector<8x8xf32>
    %44 = arith.mulf %30, %43 : vector<8x8xf32>
    %c0_35 = arith.constant 0 : index
    %c0_36 = arith.constant 0 : index
    %c0_37 = arith.constant 0 : index
    %45 = vector.load %arg8[%c0_35, %c0_36, %c0_37] : memref<1x8x32xf32, #tpu.memory_space<vmem>>, vector<1x8x8xf32>
    %46 = vector.shape_cast %45 : vector<1x8x8xf32> to vector<8x8xf32>
    %47 = vector.shape_cast %44 : vector<8x8xf32> to vector<1x8x8xf32>
    tpu.vector_store %arg8[%c0_35, %c0_36, %c0_37], %47 {strides = array<i32>} : memref<1x8x32xf32, #tpu.memory_space<vmem>>, vector<1x8x8xf32>,
    %48 = vector.extract_strided_slice %23 {offsets = [8, 0], sizes = [8, 8], strides = [1, 1]} : vector<32x8xf32> to vector<8x8xf32>
    %49 = arith.addf %48, %9 : vector<8x8xf32>
    %cst_38 = arith.constant dense<0xFF800000> : vector<8xf32>
    %50 = vector.multi_reduction <maximumf>, %49, %cst_38 [1] : vector<8x8xf32> to vector<8xf32>
    %51 = vector.shape_cast %50 : vector<8xf32> to vector<8x1xf32>
    %52 = vector.broadcast %51 : vector<8x1xf32> to vector<8x8xf32>
    %53 = arith.subf %49, %52 : vector<8x8xf32>
    %54 = math.exp %53 : vector<8x8xf32>
    %cst_39 = arith.constant dense<0.000000e+00> : vector<8xf32>
    %55 = vector.multi_reduction <add>, %54, %cst_39 [1] : vector<8x8xf32> to vector<8xf32>
    %56 = vector.shape_cast %55 : vector<8xf32> to vector<8x1xf32>
    %cst_40 = arith.constant 1.000000e+00 : f32
    %57 = vector.broadcast %cst_40 : f32 to vector<8x1xf32>
    %58 = arith.divf %57, %56 : vector<8x1xf32>
    %c0_41 = arith.constant 0 : index
    %c1_42 = arith.constant 1 : index
    %c0_43 = arith.constant 0 : index
    %c0_44 = arith.constant 0 : index
    %59 = vector.load %arg6[%c0_41, %c1_42, %c0_43, %c0_44] : memref<1x4x8x32xf32, #tpu.memory_space<vmem>>, vector<1x1x8x32xf32>
    %60 = vector.shape_cast %59 : vector<1x1x8x32xf32> to vector<8x32xf32>
    %cst_45 = arith.constant dense<0.000000e+00> : vector<8x32xf32>
    %61 = tpu.matmul %54, %60, %cst_45 {dimension_numbers = #tpu.dot_dimension_numbers<[1], [0], [0], [1], [0, 0, 1, 1], [], []>} : vector<8x8xf32>, vector<8x32xf32>, vector<8x32xf32> -> vector<8x32xf32>
    %62 = vector.broadcast %58 : vector<8x1xf32> to vector<8x32xf32>
    %63 = arith.mulf %61, %62 : vector<8x32xf32>
    %c0_46 = arith.constant 0 : index
    %c0_47 = arith.constant 0 : index
    %c32 = arith.constant 32 : index
    %64 = vector.load %arg7[%c0_46, %c0_47, %c32] : memref<1x8x128xf32, #tpu.memory_space<vmem>>, vector<1x8x32xf32>
    %65 = vector.shape_cast %64 : vector<1x8x32xf32> to vector<8x32xf32>
    %66 = vector.shape_cast %63 : vector<8x32xf32> to vector<1x8x32xf32>
    tpu.vector_store %arg7[%c0_46, %c0_47, %c32], %66 {strides = array<i32>} : memref<1x8x128xf32, #tpu.memory_space<vmem>>, vector<1x8x32xf32>,
    %67 = vector.broadcast %58 : vector<8x1xf32> to vector<8x8xf32>
    %68 = arith.mulf %54, %67 : vector<8x8xf32>
    %c0_48 = arith.constant 0 : index
    %c0_49 = arith.constant 0 : index
    %c8 = arith.constant 8 : index
    %69 = vector.load %arg8[%c0_48, %c0_49, %c8] : memref<1x8x32xf32, #tpu.memory_space<vmem>>, vector<1x8x8xf32>
    %70 = vector.shape_cast %69 : vector<1x8x8xf32> to vector<8x8xf32>
    %71 = vector.shape_cast %68 : vector<8x8xf32> to vector<1x8x8xf32>
    tpu.vector_store %arg8[%c0_48, %c0_49, %c8], %71 {strides = array<i32>} : memref<1x8x32xf32, #tpu.memory_space<vmem>>, vector<1x8x8xf32>,
    %72 = vector.extract_strided_slice %23 {offsets = [16, 0], sizes = [8, 8], strides = [1, 1]} : vector<32x8xf32> to vector<8x8xf32>
    %73 = arith.addf %72, %9 : vector<8x8xf32>
    %cst_50 = arith.constant dense<0xFF800000> : vector<8xf32>
    %74 = vector.multi_reduction <maximumf>, %73, %cst_50 [1] : vector<8x8xf32> to vector<8xf32>
    %75 = vector.shape_cast %74 : vector<8xf32> to vector<8x1xf32>
    %76 = vector.broadcast %75 : vector<8x1xf32> to vector<8x8xf32>
    %77 = arith.subf %73, %76 : vector<8x8xf32>
    %78 = math.exp %77 : vector<8x8xf32>
    %cst_51 = arith.constant dense<0.000000e+00> : vector<8xf32>
    %79 = vector.multi_reduction <add>, %78, %cst_51 [1] : vector<8x8xf32> to vector<8xf32>
    %80 = vector.shape_cast %79 : vector<8xf32> to vector<8x1xf32>
    %cst_52 = arith.constant 1.000000e+00 : f32
    %81 = vector.broadcast %cst_52 : f32 to vector<8x1xf32>
    %82 = arith.divf %81, %80 : vector<8x1xf32>
    %c0_53 = arith.constant 0 : index
    %c2_54 = arith.constant 2 : index
    %c0_55 = arith.constant 0 : index
    %c0_56 = arith.constant 0 : index
    %83 = vector.load %arg6[%c0_53, %c2_54, %c0_55, %c0_56] : memref<1x4x8x32xf32, #tpu.memory_space<vmem>>, vector<1x1x8x32xf32>
    %84 = vector.shape_cast %83 : vector<1x1x8x32xf32> to vector<8x32xf32>
    %cst_57 = arith.constant dense<0.000000e+00> : vector<8x32xf32>
    %85 = tpu.matmul %78, %84, %cst_57 {dimension_numbers = #tpu.dot_dimension_numbers<[1], [0], [0], [1], [0, 0, 1, 1], [], []>} : vector<8x8xf32>, vector<8x32xf32>, vector<8x32xf32> -> vector<8x32xf32>
    %86 = vector.broadcast %82 : vector<8x1xf32> to vector<8x32xf32>
    %87 = arith.mulf %85, %86 : vector<8x32xf32>
    %c0_58 = arith.constant 0 : index
    %c0_59 = arith.constant 0 : index
    %c64 = arith.constant 64 : index
    %88 = vector.load %arg7[%c0_58, %c0_59, %c64] : memref<1x8x128xf32, #tpu.memory_space<vmem>>, vector<1x8x32xf32>
    %89 = vector.shape_cast %88 : vector<1x8x32xf32> to vector<8x32xf32>
    %90 = vector.shape_cast %87 : vector<8x32xf32> to vector<1x8x32xf32>
    tpu.vector_store %arg7[%c0_58, %c0_59, %c64], %90 {strides = array<i32>} : memref<1x8x128xf32, #tpu.memory_space<vmem>>, vector<1x8x32xf32>,
    %91 = vector.broadcast %82 : vector<8x1xf32> to vector<8x8xf32>
    %92 = arith.mulf %78, %91 : vector<8x8xf32>
    %c0_60 = arith.constant 0 : index
    %c0_61 = arith.constant 0 : index
    %c16 = arith.constant 16 : index
    %93 = vector.load %arg8[%c0_60, %c0_61, %c16] : memref<1x8x32xf32, #tpu.memory_space<vmem>>, vector<1x8x8xf32>
    %94 = vector.shape_cast %93 : vector<1x8x8xf32> to vector<8x8xf32>
    %95 = vector.shape_cast %92 : vector<8x8xf32> to vector<1x8x8xf32>
    tpu.vector_store %arg8[%c0_60, %c0_61, %c16], %95 {strides = array<i32>} : memref<1x8x32xf32, #tpu.memory_space<vmem>>, vector<1x8x8xf32>,
    %96 = vector.extract_strided_slice %23 {offsets = [24, 0], sizes = [8, 8], strides = [1, 1]} : vector<32x8xf32> to vector<8x8xf32>
    %97 = arith.addf %96, %9 : vector<8x8xf32>
    %cst_62 = arith.constant dense<0xFF800000> : vector<8xf32>
    %98 = vector.multi_reduction <maximumf>, %97, %cst_62 [1] : vector<8x8xf32> to vector<8xf32>
    %99 = vector.shape_cast %98 : vector<8xf32> to vector<8x1xf32>
    %100 = vector.broadcast %99 : vector<8x1xf32> to vector<8x8xf32>
    %101 = arith.subf %97, %100 : vector<8x8xf32>
    %102 = math.exp %101 : vector<8x8xf32>
    %cst_63 = arith.constant dense<0.000000e+00> : vector<8xf32>
    %103 = vector.multi_reduction <add>, %102, %cst_63 [1] : vector<8x8xf32> to vector<8xf32>
    %104 = vector.shape_cast %103 : vector<8xf32> to vector<8x1xf32>
    %cst_64 = arith.constant 1.000000e+00 : f32
    %105 = vector.broadcast %cst_64 : f32 to vector<8x1xf32>
    %106 = arith.divf %105, %104 : vector<8x1xf32>
    %c0_65 = arith.constant 0 : index
    %c3_66 = arith.constant 3 : index
    %c0_67 = arith.constant 0 : index
    %c0_68 = arith.constant 0 : index
    %107 = vector.load %arg6[%c0_65, %c3_66, %c0_67, %c0_68] : memref<1x4x8x32xf32, #tpu.memory_space<vmem>>, vector<1x1x8x32xf32>
    %108 = vector.shape_cast %107 : vector<1x1x8x32xf32> to vector<8x32xf32>
    %cst_69 = arith.constant dense<0.000000e+00> : vector<8x32xf32>
    %109 = tpu.matmul %102, %108, %cst_69 {dimension_numbers = #tpu.dot_dimension_numbers<[1], [0], [0], [1], [0, 0, 1, 1], [], []>} : vector<8x8xf32>, vector<8x32xf32>, vector<8x32xf32> -> vector<8x32xf32>
    %110 = vector.broadcast %106 : vector<8x1xf32> to vector<8x32xf32>
    %111 = arith.mulf %109, %110 : vector<8x32xf32>
    %c0_70 = arith.constant 0 : index
    %c0_71 = arith.constant 0 : index
    %c96 = arith.constant 96 : index
    %112 = vector.load %arg7[%c0_70, %c0_71, %c96] : memref<1x8x128xf32, #tpu.memory_space<vmem>>, vector<1x8x32xf32>
    %113 = vector.shape_cast %112 : vector<1x8x32xf32> to vector<8x32xf32>
    %114 = vector.shape_cast %111 : vector<8x32xf32> to vector<1x8x32xf32>
    tpu.vector_store %arg7[%c0_70, %c0_71, %c96], %114 {strides = array<i32>} : memref<1x8x128xf32, #tpu.memory_space<vmem>>, vector<1x8x32xf32>,
    %115 = vector.broadcast %106 : vector<8x1xf32> to vector<8x8xf32>
    %116 = arith.mulf %102, %115 : vector<8x8xf32>
    %c0_72 = arith.constant 0 : index
    %c0_73 = arith.constant 0 : index
    %c24 = arith.constant 24 : index
    %117 = vector.load %arg8[%c0_72, %c0_73, %c24] : memref<1x8x32xf32, #tpu.memory_space<vmem>>, vector<1x8x8xf32>
    %118 = vector.shape_cast %117 : vector<1x8x8xf32> to vector<8x8xf32>
    %119 = vector.shape_cast %116 : vector<8x8xf32> to vector<1x8x8xf32>
    tpu.vector_store %arg8[%c0_72, %c0_73, %c24], %119 {strides = array<i32>} : memref<1x8x32xf32, #tpu.memory_space<vmem>>, vector<1x8x8xf32>,
    return
  }
  func.func @transform_0(%arg0: i32, %arg1: i32) -> (i32, i32, i32) {
    %c0_i32 = arith.constant 0 : i32
    %c0_i32_0 = arith.constant 0 : i32
    %c0_i32_1 = arith.constant 0 : i32
    return %arg0, %c0_i32, %c0_i32_0 : i32, i32, i32
  }
  func.func @transform_1(%arg0: i32, %arg1: i32) -> (i32, i32, i32) {
    %c0_i32 = arith.constant 0 : i32
    %c0_i32_0 = arith.constant 0 : i32
    return %arg0, %arg1, %c0_i32 : i32, i32, i32
  }
  func.func @transform_2(%arg0: i32, %arg1: i32) -> (i32, i32, i32, i32) {
    %c0_i32 = arith.constant 0 : i32
    %c0_i32_0 = arith.constant 0 : i32
    %c0_i32_1 = arith.constant 0 : i32
    return %arg0, %c0_i32, %arg1, %c0_i32_0 : i32, i32, i32, i32
  }
  func.func @transform_3(%arg0: i32, %arg1: i32) -> (i32, i32, i32) {
    %c0_i32 = arith.constant 0 : i32
    %c0_i32_0 = arith.constant 0 : i32
    %c0_i32_1 = arith.constant 0 : i32
    return %arg0, %c0_i32, %c0_i32_0 : i32, i32, i32
  }
  func.func @transform_4(%arg0: i32, %arg1: i32) -> (i32, i32, i32, i32) {
    %c0_i32 = arith.constant 0 : i32
    %c0_i32_0 = arith.constant 0 : i32
    %c0_i32_1 = arith.constant 0 : i32
    %c0_i32_2 = arith.constant 0 : i32
    return %arg0, %c0_i32, %c0_i32_0, %c0_i32_1 : i32, i32, i32, i32
  }
  func.func @transform_5(%arg0: i32, %arg1: i32) -> (i32, i32, i32) {
    %c0_i32 = arith.constant 0 : i32
    %c0_i32_0 = arith.constant 0 : i32
    return %arg0, %arg1, %c0_i32 : i32, i32, i32
  }
  func.func @transform_6(%arg0: i32, %arg1: i32) -> (i32, i32, i32) {
    %c0_i32 = arith.constant 0 : i32
    %c0_i32_0 = arith.constant 0 : i32
    return %arg0, %arg1, %c0_i32 : i32, i32, i32
  }
}

</mosaic_0001>

<bundles_post_ra>
// kernel: tpu_custom_call.1
= control target key start
LH: loop header
LB: loop body
LE: loop exit
PB: predicated region body
PF: predicated region fallthrough
CT: control target
= control target key end

     0   :  { %s1446_s0 = inlined_call_operand.vmem [shape: s32[2,1,8], index: 0, kind: input, shape index: {}]   ;;  %s1447_s1 = inlined_call_operand.vmem [shape: s32[2,8,1], index: 1, kind: input, shape index: {}]   ;;  %s1448_s2 = inlined_call_operand.vmem [shape: f32[2,4,8,32], index: 2, kind: input, shape index: {}]   ;;  %s1449_s3 = inlined_call_operand.vmem [shape: f32[2,32,8], index: 3, kind: input, shape index: {}]   ;;  %s1450_s4 = inlined_call_operand.hbm [shape: f32[2,4,8,32], index: 4, kind: input, shape index: {}]   ;;  %s1451_s5 = inlined_call_operand.hbm [shape: f32[2,8,128], index: 5, kind: output, shape index: {0}]   ;;  %s1452_s6 = inlined_call_operand.hbm [shape: f32[2,8,32], index: 6, kind: output, shape index: {1}]  }
   0x1   :  { %1454 = sst [smem:[#allocation12_spill]] %s1446_s0 }
   0x2   :  { %12 = vsyncpa [#allocation3], 0 }
   0x3   :  { %14 = vsyncpa [#allocation3 + $0x1], 0 }
   0x4   :  { %15 = vsyncpa [#allocation4], 0 }
   0x5   :  { %17 = vsyncpa [#allocation4 + $0x1], 0 }
   0x6   :  { %18 = vsyncpa [#allocation7], 0 }
   0x7   :  { %20 = vsyncpa [#allocation7 + $0x1], 0  ;;  %s1240_s21 = smov 0   ;;  %s1242_s22 = smov 0  }
   0x8   :  { %s1244_s23 = smov 0   ;;  %s1246_s24 = smov 0  }
   0x9   :  { %s1248_s25 = smov 0   ;;  %s1250_s26 = smov 0  }
   0xa LB: > { %s907_s27 = sadd.s32 4294967295, %s1193_s26   ;;  %s908_s28 = sadd.s32 4294967294, %s1193_s26   ;;  %s1193_s26 = sphi %s1250_s26, %s26_s26   ;;  %s1189_s25 = sphi %s1248_s25, %s1466_s25   ;;  %s1185_s24 = sphi %s1246_s24, %s1465_s24   ;;  %s1181_s23 = sphi %s1244_s23, %s1464_s23   ;;  %s1177_s22 = sphi %s1242_s22, %s1463_s22   ;;  %s1173_s21 = sphi %s1240_s21, %s1462_s21  }
   0xb   : > { %s38_s29 = sadd.s32 1, %s1189_s25  ;;  %s153_s30 = sadd.s32 1, %s1181_s23 }
   0xc   : > { %p40_p0 = scmp.ge.s32.totalorder %s38_s29, 2  ;;  %p160_p1 = scmp.ne.s32.totalorder %s1181_s23, %s1177_s22 }
   0xd   : > { %p161_p2 = scmp.eq.s32.totalorder %s1193_s26, 0  ;;  %p166_p3 = scmp.ne.s32.totalorder %s1177_s22, %s1173_s21 }
   0xe   : > { %s1468_s29 = smov (%p40_p0, %s38_s29), 0  ;;  %p167_p5 = scmp.eq.s32.totalorder %s907_s27, 0 }
   0xf   : > { %1455 = sst [smem:[#allocation11_spill]] %s1468_s29  ;;  %p1281_p4 = por %p161_p2, %p160_p1 }
  0x10   : > { %s150_s8 = ssub.s32 %s1189_s25, %s1468_s29  ;;  %p192_p6 = scmp.eq.s32.totalorder %s907_s27, 1 }
  0x11   : > { %p151_p7 = scmp.eq.s32.totalorder %s150_s8, 0  ;;  %p1287_p8 = por %p167_p5, %p166_p3 }
  0x12   : > { %p1291_p9 = por %p192_p6, %p160_p1  ;;  %p198_p10 = scmp.eq.s32.totalorder %s908_s28, 1 }
  0x13   : > { %s1296_s11 = scalar_select %p151_p7, %s1181_s23, %s153_s30  }
  0x14   : > { %p1298_p11 = por %p198_p10, %p166_p3  ;;  %p910_p12 = scmp.ge.s32.totalorder %s1193_s26, 2 }
  0x15   : > { %p971_p13 = scmp.lt.s32.totalorder %s1193_s26, 2  ;;  %s281_s13 = sand.u32 1, %s1181_s23  }
  0x16   : > { %s911_s14 = sshll.u32 %s281_s13, 5  ;;  %s943_s15 = sshll.u32 %s1189_s25, 5 }
  0x17   : > { %s290_s18 = scalar_lea.hbm %s1450_s4, %s943_s15  ;;  %s285_s19 = scalar_lea.vmem [#allocation2], %s911_s14 }
  0x18   : > { %s293_s20 = sshll.u32 %s285_s19, 4  ;;  %s291_s27 = sshll.u32 %s290_s18, 4  ;;  %s294_s20 = int_to_ptr.vmem [resolvable:$true] %s293_s20  ;;  %s292_s27 = int_to_ptr.hbm [resolvable:$true] %s291_s27 }
  0x19   : > { %p961_p0 = pnand %p971_p13, %p1281_p4  ;;  %p914_p1 = scmp.ge.s32.totalorder %s1193_s26, 1 }
  0x1a   : > { %s282_s28 = scalar_lea.sflag [#allocation3], %s281_s13  ;;  %s1195_s30 = smov 128  }
  0x1b   : > { %s1196_s8 = smov 8   ;;  %p301_p2 = scmp.lt.s32.totalorder %s1193_s26, 3 }
  0x1c   : > { %963 = dma.hbm_to_vmem [thread:$0]  (!%p961_p0), %s292_s27, 512, %s294_s20, %s282_s28, %s1195_s30, %s1195_s30, %s1196_s8  }
  0x1d   : > { %p302_p3 = pnand %p914_p1, %p301_p2 }
  0x1e   : > { %s1314_s29 = sand.u32 (!%p302_p3), 1, %s1177_s22  }
  0x1f   : > { %305 = sbr.rel (%p302_p3) target bundleno = 583 (0x247), region = 40  ;;  %s915_s14 = sshll.u32 (!%p302_p3), %s1314_s29, 5 }
  0x20   : > { %s308_s15 = scalar_lea.sflag (!%p302_p3), [#allocation3], %s1314_s29  ;;  %s1318_s16 = scalar_lea.vmem (!%p302_p3), [#allocation2], %s915_s14 }
  0x24   : > { %1160 = dma.done.wait (%p1287_p8), %s308_s15, 512  }
  0x25   : > { %1162 = vsyncadd (%p1287_p8), %s308_s15, 4294966784  ;;  %p369_p4 = scmp.lt.s32.totalorder %s1185_s24, 1  ;;  %v1197_v0 = vmov 0   ;;  %s1460_s0 = sld [smem:[#allocation12_spill]]  ;;  %vm415_vm0 = vcmask 261120   ;;  %v1198_v16 = vmov -inf  }
  0x26   : > { %1031 = vset.pattern.permute.xlu0 %v1197_v0  ;;  %vm458_vm2 = vcmask 64512   ;;  %v483_v30 = vld [vmem:[%s1318_s16] sm:$0xff]  ;;  %v931_v31 = vld [vmem:[%s1318_s16 + $0x8] sm:$0xff]  ;;  %v935_v32 = vld [vmem:[%s1318_s16 + $0x18] sm:$0xff]  ;;  %s1202_s19 = smov 16   ;;  %s1203_s28 = smov 32  }
  0x27   : > { %s1326_s7 = scalar_select %p369_p4, %s1185_s24, 1  ;;  %502 = vmatpush.msra.mxu1 %v483_v30  ;;  %v933_v33 = vld [vmem:[%s1318_s16 + $0x10] sm:$0xff] }
  0x28   : > { %s1199_s16 = smov 8   ;;  %s1204_s30 = smov 96  }
  0x29   : > { %s944_s13 = sshll.u32 %s1326_s7, 5  ;;  %s918_s17 = sshll.u32 %s1326_s7, 3  ;;  %684 = vmatpush.msrb.mxu1 %v935_v32 }
  0x2a   : > { %s1333_s20 = scalar_lea.vmem %s1448_s2, %s944_s13  ;;  %s391_s9 = scalar_lea.vmem %s1449_s3, %s944_s13 }
  0x2b   : > { %v403_v1 = vld [vmem:[%s391_s9 + $0x18] sm:$0xff]  ;;  %v402_v2 = vld [vmem:[%s391_s9 + $0x10] sm:$0xff]  ;;  %s378_s14 = scalar_lea.vmem %s1447_s1, %s918_s17  ;;  %v404_v3 = vld [vmem:[%s1333_s20] sm:$0xff]  ;;  %s371_s13 = scalar_lea.vmem %s1460_s0, %s1326_s7 }
  0x2c   : > { %440 = vmatpush.msra.mxu0 %v403_v1  ;;  %947 = vmatpush.msra.mxu3 %v403_v1  ;;  %v925_v4 = vld [vmem:[%s1333_s20 + $0x18] sm:$0xff]  ;;  %v401_v5 = vld [vmem:[%s391_s9 + $0x8] sm:$0xff]  ;;  %v400_v6 = vld [vmem:[%s391_s9] sm:$0xff]  ;;  %v411_v9 = vmul.f32 0.17677669, %v404_v3  ;;  %s1200_s7 = smov 24  }
  0x2d   : > { %946 = vmatpush.msra.mxu2 %v403_v1  ;;  %v924_v7 = vld [vmem:[%s1333_s20 + $0x10] sm:$0xff]  ;;  %v393_v8 = vld [vmem:[%s378_s14] sm:$0xff]  ;;  %v414_v10 = vmul.f32 0.17677669, %v925_v4  ;;  %v923_v12 = vld [vmem:[%s1333_s20 + $0x8] sm:$0xff]  ;;  %s1201_s17 = smov 64  }
  0x2e   : > { %441 = vmatpush.msra.mxu0 %v402_v2  ;;  %949 = vmatpush.msra.mxu3 %v402_v2  ;;  %v413_v11 = vmul.f32 0.17677669, %v924_v7  ;;  %v412_v13 = vmul.f32 0.17677669, %v923_v12  ;;  %v1032_v14 = vld [vmem:[%s371_s13] ss:$0 sm:$0xff] }
  0x2f   : > { %948 = vmatpush.msra.mxu2 %v402_v2  ;;  %395 = vperm.xlu0 %1031, %v393_v8   ;;  %s916_s20 = sshll.u32 %s1314_s29, 3  ;;  %s939_s8 = sshll.u32 %s1185_s24, 3 }
  0x30   : > { %442 = vmatpush.msra.mxu0 %v401_v5  ;;  %951 = vmatpush.msra.mxu3 %v401_v5  ;;  %s361_s27 = scalar_lea.vmem [#allocation5], %s916_s20  ;;  %s1386_s9 = scalar_lea.vmem [#allocation6], %s916_s20 }
  0x31   : > { %950 = vmatpush.msra.mxu2 %v401_v5  ;;  %s720_s18 = scalar_lea.hbm %s1451_s5, %s939_s8  ;;  %s722_s13 = sshll.u32 %s361_s27, 4  ;;  %s723_s13 = int_to_ptr.vmem [resolvable:$true] %s722_s13 }
  0x32   : > { %443 = vmatpush.msra.mxu0 %v400_v6  ;;  %953 = vmatpush.msra.mxu3 %v400_v6  ;;  %s1099_s15 = scalar_lea.hbm %s1451_s5, 16 }
  0x33   : > { %926 = vmatmul.msk.f32.vlgmr.msra.gmra.mxu0 %vm415_vm0, %v411_v9  ;;  %929 = vmatmul.msk.f32.vlgmr.msra.gmra.mxu3 %vm415_vm0, %v414_v10 }
  0x34   : > { %952 = vmatpush.msra.mxu2 %v400_v6  ;;  %620 = vmatpush.msrb.mxu3 %v933_v33 }
  0x35   : > { %928 = vmatmul.msk.f32.vlgmr.msra.gmra.mxu2 %vm415_vm0, %v413_v11 }
  0x36   : > { %556 = vmatpush.msrb.mxu2 %v931_v31 }
  0x3b   : > { %927 = vmatmul.msk.f32.gmra.mxu0 %vm415_vm0, %v412_v13 }
  0xa1   : > { %v396_v15 = vpop.permute.xlu0 %395 }
  0xa2   : > { %vm398_vm1 = vcmp.eq.s32.totalorder %v396_v15, %v1032_v14 }
  0xa3   : > { %v399_v17 = vsel %vm398_vm1, 0.0, %v1198_v16 }
  0xb0   : > { %v445_v18 = vpop.f32.mrf.mxu0 }
  0xb1   : > { %v457_v19 = vadd.f32 %v445_v18, %v399_v17 }
  0xb3   : > { %v459_v20 = vsel %vm458_vm2, %v457_v19, -inf }
  0xb4   : > { %460 = vmax.xlane.f32.xlu0 %v459_v20 }
  0xb6   : > { %v454_v21 = vpop.f32.mrf.mxu3 }
  0xb7   : > { %v639_v22 = vadd.f32 %v454_v21, %v399_v17 }
  0xb8   : > { %v448_v23 = vpop.f32.mrf.mxu0  ;;  %v451_v27 = vpop.f32.mrf.mxu2 }
  0xb9   : > { %v511_v24 = vadd.f32 %v448_v23, %v399_v17  ;;  %v640_v25 = vsel %vm458_vm2, %v639_v22, -inf  ;;  %v575_v28 = vadd.f32 %v451_v27, %v399_v17 }
  0xba   : > { %641 = vmax.xlane.f32.xlu2 %v640_v25 }
  0xbb   : > { %v512_v26 = vsel %vm458_vm2, %v511_v24, -inf  ;;  %v576_v29 = vsel %vm458_vm2, %v575_v28, -inf }
  0xbc   : > { %513 = vmax.xlane.f32.xlu1 %v512_v26 }
  0xc4   : > { %577 = vmax.xlane.f32.xlu1 %v576_v29 }
 0x127   : > { %v461_v34 = vpop.xlane.xlu0 %460 }
 0x128   : > { %v462_v35 = vsub.f32 %v457_v19, %v461_v34 }
 0x12a   : > { %v463_v36 = vmul.f32 1.442695, %v462_v35 }
 0x12c   : > { %1033 = vpow2.f32 %v463_v36 }
 0x12d   : > { %v642_v37 = vpop.xlane.xlu2 %641 }
 0x12e   : > { %v643_v38 = vsub.f32 %v639_v22, %v642_v37 }
 0x12f   : > { %v514_v39 = vpop.xlane.xlu1 %513 }
 0x130   : > { %v644_v40 = vmul.f32 1.442695, %v643_v38  ;;  %v515_v41 = vsub.f32 %v511_v24, %v514_v39 }
 0x132   : > { %v1361_v42 = vpop.eup %1033  ;;  %v516_v43 = vmul.f32 1.442695, %v515_v41  ;;  %1035 = vpow2.f32 %v644_v40 }
 0x133   : > { %930 = vmatmul.msk.f32.vlgmr.msra.gmra.mxu1 %vm458_vm2, %v1361_v42  ;;  %v465_v53 = vsel %vm458_vm2, %v1361_v42, 0.0 }
 0x134   : > { %1037 = vpow2.f32 %v516_v43 }
 0x137   : > { %v578_v44 = vpop.xlane.xlu1 %577 }
 0x138   : > { %v579_v45 = vsub.f32 %v575_v28, %v578_v44  ;;  %v1365_v46 = vpop.eup %1035 }
 0x139   : > { %v646_v51 = vsel %vm458_vm2, %v1365_v46, 0.0 }
 0x13a   : > { %v1038_v47 = vpop.eup %1037  ;;  %v580_v48 = vmul.f32 1.442695, %v579_v45 }
 0x13b   : > { %932 = vmatmul.msk.f32.vlgmr.msrb.gmra.mxu2 %vm458_vm2, %v1038_v47  ;;  %936 = vmatmul.msk.f32.vlgmr.msrb.gmra.mxu1 %vm458_vm2, %v1365_v46  ;;  %v518_v49 = vsel %vm458_vm2, %v1038_v47, 0.0 }
 0x13c   : > { %1039 = vpow2.f32 %v580_v48  ;;  %519 = vadd.xlane.f32.xlu2 %v518_v49 }
 0x142   : > { %v1371_v50 = vpop.eup %1039 }
 0x143   : > { %934 = vmatmul.msk.f32.vlgmr.msrb.gmra.mxu3 %vm458_vm2, %v1371_v50  ;;  %v582_v52 = vsel %vm458_vm2, %v1371_v50, 0.0 }
 0x144   : > { %647 = vadd.xlane.f32.xlu2 %v646_v51  ;;  %583 = vadd.xlane.f32.xlu1 %v582_v52 }
 0x14c   : > { %466 = vadd.xlane.f32.xlu1 %v465_v53 }
 0x1af   : > { %v520_v54 = vpop.xlane.xlu2 %519 }
 0x1b0   : > { %1041 = vrcp.f32 %v520_v54  ;;  %v532_v60 = vand.u32 2147483648, %v520_v54  ;;  %v530_v62 = vand.u32 2147483647, %v520_v54  ;;  %vm526_vm4 = vweird.f32 %v520_v54  ;;  %v504_v37 = vpop.f32.mrf.mxu1 }
 0x1b2   : > { %v533_v1 = vor.u32 1.1754944e-38, %v532_v60  ;;  %vm531_vm6 = vcmp.eq.f32.partialorder %v530_v62, 8.507059e+37 }
 0x1b6   : > { %v1042_v55 = vpop.eup %1041 }
 0x1b7   : > { %v522_v56 = vmul.f32 %v1042_v55, %v520_v54  ;;  %v648_v57 = vpop.xlane.xlu2 %647  ;;  %v584_v58 = vpop.xlane.xlu1 %583  ;;  %vm527_vm3 = vweird.f32 %v1042_v55 }
 0x1b8   : > { %1043 = vrcp.f32 %v648_v57  ;;  %vm528_vm5 = vmor %vm526_vm4, %vm527_vm3  ;;  %v660_v11 = vand.u32 2147483648, %v648_v57  ;;  %v658_v13 = vand.u32 2147483647, %v648_v57  ;;  %v596_v14 = vand.u32 2147483648, %v584_v58  ;;  %v686_v45 = vpop.f32.mrf.mxu1 }
 0x1b9   : > { %v523_v59 = vsub.f32 1.0, %v522_v56  ;;  %1045 = vrcp.f32 %v584_v58  ;;  %v594_v16 = vand.u32 2147483647, %v584_v58  ;;  %vm654_vm9 = vweird.f32 %v648_v57 }
 0x1ba   : > { %v661_v19 = vor.u32 1.1754944e-38, %v660_v11  ;;  %vm590_vm11 = vweird.f32 %v584_v58  ;;  %vm659_vm12 = vcmp.eq.f32.partialorder %v658_v13, 8.507059e+37  ;;  %v597_v23 = vor.u32 1.1754944e-38, %v596_v14 }
 0x1bb   : > { %v524_v61 = vmul.f32 %v1042_v55, %v523_v59  ;;  %vm595_vm14 = vcmp.eq.f32.partialorder %v594_v16, 8.507059e+37 }
 0x1bd   : > { %v525_v63 = vadd.f32 %v1042_v55, %v524_v61 }
 0x1be   : > { %v1044_v0 = vpop.eup %1043  ;;  %v558_v40 = vpop.f32.mrf.mxu2 }
 0x1bf   : > { %v1046_v2 = vpop.eup %1045  ;;  %v650_v3 = vmul.f32 %v1044_v0, %v648_v57  ;;  %v529_v4 = vsel %vm528_vm5, %v1042_v55, %v525_v63  ;;  %v467_v5 = vpop.xlane.xlu1 %466  ;;  %vm655_vm7 = vweird.f32 %v1044_v0  ;;  %vm566_vm5 = vcmask 523520  }
 0x1c0   : > { %v586_v6 = vmul.f32 %v1046_v2, %v584_v58  ;;  %v534_v7 = vsel %vm531_vm6, %v533_v1, %v529_v4  ;;  %1047 = vrcp.f32 %v467_v5  ;;  %vm591_vm8 = vweird.f32 %v1046_v2  ;;  %vm656_vm10 = vmor %vm654_vm9, %vm655_vm7 }
 0x1c1   : > { %v651_v8 = vsub.f32 1.0, %v650_v3  ;;  %v568_v9 = vmul.f32 %v1038_v47, %v534_v7  ;;  %vm592_vm13 = vmor %vm590_vm11, %vm591_vm8  ;;  %v479_v30 = vand.u32 2147483648, %v467_v5  ;;  %v477_v34 = vand.u32 2147483647, %v467_v5 }
 0x1c2   : > { %v587_v10 = vsub.f32 1.0, %v586_v6  ;;  %vm473_vm1 = vweird.f32 %v467_v5  ;;  %v561_v44 = vmul.f32 %v558_v40, %v534_v7  ;;  %vm630_vm6 = vcmask 785920  }
 0x1c3   : > { %v652_v12 = vmul.f32 %v1044_v0, %v651_v8  ;;  %570 = vrot.lane.b32.xlu1 %v568_v9, %s1199_s16  ;;  %v480_v36 = vor.u32 1.1754944e-38, %v479_v30  ;;  %vm478_vm4 = vcmp.eq.f32.partialorder %v477_v34, 8.507059e+37  ;;  %s724_s16 = sshll.u32 %s720_s18, 4  ;;  %s725_s16 = int_to_ptr.hbm [resolvable:$true] %s724_s16 }
 0x1c4   : > { %v588_v15 = vmul.f32 %v1046_v2, %v587_v10  ;;  %s1093_s20 = sshra.s32 %s725_s16, 4  ;;  %s1094_s20 = int_to_ptr.hbm [resolvable:$true] %s1093_s20 }
 0x1c5   : > { %v653_v17 = vadd.f32 %v1044_v0, %v652_v12  ;;  %p1100_p8 = scmp.lt.s32.totalorder %s1094_s20, %s1451_s5 }
 0x1c6   : > { %v1048_v18 = vpop.eup %1047  ;;  %v589_v20 = vadd.f32 %v1046_v2, %v588_v15  ;;  %v622_v29 = vpop.f32.mrf.mxu3 }
 0x1c7   : > { %v657_v21 = vsel %vm656_vm10, %v1044_v0, %v653_v17  ;;  %v469_v22 = vmul.f32 %v1048_v18, %v467_v5  ;;  %vm474_vm15 = vweird.f32 %v1048_v18 }
 0x1c8   : > { %v662_v24 = vsel %vm659_vm12, %v661_v19, %v657_v21  ;;  %v593_v25 = vsel %vm592_vm13, %v1046_v2, %v589_v20  ;;  %vm475_vm3 = vmor %vm473_vm1, %vm474_vm15 }
 0x1c9   : > { %v696_v26 = vmul.f32 %v1365_v46, %v662_v24  ;;  %v470_v27 = vsub.f32 1.0, %v469_v22  ;;  %v598_v28 = vsel %vm595_vm14, %v597_v23, %v593_v25  ;;  %v689_v46 = vmul.f32 %v686_v45, %v662_v24 }
 0x1ca   : > { %v625_v31 = vmul.f32 %v622_v29, %v598_v28  ;;  %v632_v32 = vmul.f32 %v1371_v50, %v598_v28 }
 0x1cb   : > { %v471_v33 = vmul.f32 %v1048_v18, %v470_v27  ;;  %698 = vrot.lane.b32.xlu1 %v696_v26, %s1200_s7 }
 0x1cc   : > { %627 = vrot.lane.b32.xlu2 %v625_v31, %s1201_s17  ;;  %634 = vrot.lane.b32.xlu0 %v632_v32, %s1202_s19  ;;  %s735_s17 = scalar_lea.hbm %s1452_s6, %s939_s8  ;;  %s704_s19 = scalar_lea.sflag [#allocation4], %s1314_s29 }
 0x1cd   : > { %v472_v35 = vadd.f32 %v1048_v18, %v471_v33 }
 0x1cf   : > { %v476_v38 = vsel %vm475_vm3, %v1048_v18, %v472_v35 }
 0x1d0   : > { %v481_v39 = vsel %vm478_vm4, %v480_v36, %v476_v38 }
 0x1d1   : > { %v507_v41 = vmul.f32 %v504_v37, %v481_v39  ;;  %v509_v43 = vmul.f32 %v1361_v42, %v481_v39 }
 0x1d3   : > { %508 = vst.msk [vmem:[%s361_s27] sm:$0xff] %vm415_vm0, %v507_v41  ;;  %vm573_vm0 = vcmask 130112  }
 0x1d4   : > { %563 = vrot.lane.b32.xlu2 %v561_v44, %s1203_s28  ;;  %510 = vst.msk [vmem:[%s1386_s9] sm:$0xff] %vm458_vm2, %v509_v43  ;;  %vm694_vm2 = vcmask 1048320   ;;  %s1095_s28 = scalar_lea.hbm %s1094_s20, 8 }
 0x1d5   : > { %p1096_p5 = scmp.ne.s32.totalorder %s1094_s20, %s1095_s28  ;;  %p1101_p10 = scmp.lt.s32.totalorder %s1099_s15, %s1095_s28 }
 0x1d7   : > { %p1097_p6 = pnand %p1096_p5, %p1291_p9  ;;  %p1102_p13 = por %p1101_p10, %p1100_p8 }
 0x1d9   : > { %p1098_p7 = pneg %p1097_p6 }
 0x1db   : > { %p1103_p0 = pnand %p1102_p13, %p1098_p7 }
 0x1dc   : > { %691 = vrot.lane.b32.xlu2 %v689_v46, %s1204_s30 }
 0x226   : > { %v628_v47 = vpop.permute.xlu2 %627 }
 0x22e   : > { %v564_v42 = vpop.permute.xlu2 %563 }
 0x22f   : > { %567 = vst.msk [vmem:[%s361_s27] sm:$0xff] %vm566_vm5, %v564_v42 }
 0x230   : > { %631 = vst.msk [vmem:[%s361_s27] sm:$0xff] %vm630_vm6, %v628_v47 }
 0x235   : > { %v571_v48 = vpop.permute.xlu1 %570 }
 0x236   : > { %v692_v49 = vpop.permute.xlu2 %691  ;;  %574 = vst.msk [vmem:[%s1386_s9] sm:$0xff] %vm573_vm0, %v571_v48 }
 0x237   : > { %695 = vst.msk [vmem:[%s361_s27] sm:$0xff] %vm694_vm2, %v692_v49 }
 0x238   : > { %1106 = shalt.err (!%p1103_p0)
}
 0x239   : > { %956 = dma.vmem_to_hbm [thread:$0]  (%p1291_p9), %s723_s13, 128, %s725_s16, %s704_s19   ;;  %vm637_vm7 = vcmask 195712   ;;  %vm701_vm8 = vcmask 261312  }
 0x23a   : > { %s737_s27 = sshll.u32 %s1386_s9, 4  ;;  %s739_s8 = sshll.u32 %s735_s17, 4  ;;  %s738_s27 = int_to_ptr.vmem [resolvable:$true] %s737_s27  ;;  %s740_s8 = int_to_ptr.hbm [resolvable:$true] %s739_s8 }
 0x23b   : > { %s709_s0 = scalar_lea.sflag [#allocation7], %s1314_s29  ;;  %s1121_s24 = sshra.s32 %s740_s8, 4  ;;  %s1122_s24 = int_to_ptr.hbm [resolvable:$true] %s1121_s24 }
 0x23c   : > { %s1123_s7 = scalar_lea.hbm %s1122_s24, 8  ;;  %s1127_s17 = scalar_lea.hbm %s1452_s6, 16 }
 0x23d   : > { %v699_v50 = vpop.permute.xlu1 %698  ;;  %p1124_p1 = scmp.ne.s32.totalorder %s1122_s24, %s1123_s7  ;;  %p1128_p4 = scmp.lt.s32.totalorder %s1122_s24, %s1452_s6 }
 0x23e   : > { %v635_v51 = vpop.permute.xlu0 %634  ;;  %p1129_p5 = scmp.lt.s32.totalorder %s1127_s17, %s1123_s7 }
 0x23f   : > { %638 = vst.msk [vmem:[%s1386_s9] sm:$0xff] %vm637_vm7, %v635_v51  ;;  %p1125_p2 = pnand %p1124_p1, %p1291_p9 }
 0x240   : > { %702 = vst.msk [vmem:[%s1386_s9] sm:$0xff] %vm701_vm8, %v699_v50  ;;  %p1130_p6 = por %p1129_p5, %p1128_p4 }
 0x241   : > { %p1126_p3 = pneg %p1125_p2 }
 0x243   : > { %p1131_p7 = pnand %p1130_p6, %p1126_p3 }
 0x245   : > { %1134 = shalt.err (!%p1131_p7)
}
 0x246   : > { %957 = dma.vmem_to_hbm [thread:$0]  (%p1291_p9), %s738_s27, 128, %s740_s8, %s709_s0  }
 0x247 PF: > { %s751_s29 = sand.u32 1, %s1173_s21   ;;  %p965_p8 = pnand %p910_p12, %p1298_p11 }
 0x248   : > { %s752_s9 = scalar_lea.sflag [#allocation4], %s751_s29 }
 0x249   : > { %p966_p10 = pneg %p965_p8 }
 0x24b   : > { %1164 = dma.done.wait (%p966_p10), %s752_s9, 128  }
 0x24c   : > { %1166 = vsyncadd (%p966_p10), %s752_s9, 4294967168  ;;  %s762_s28 = scalar_lea.sflag [#allocation7], %s751_s29 }
 0x24d   : > { %1168 = dma.done.wait (%p966_p10), %s762_s28, 128  }
 0x24e   : > { %1170 = vsyncadd (%p966_p10), %s762_s28, 4294967168  ;;  %s26_s26 = sadd.s32 1, %s1193_s26   ;;  %s1461_s10 = sld [smem:[#allocation11_spill]] }
 0x24f   : > { %p23_p13 = scmp.ge.s32.totalorder %s26_s26, 4   ;;  %s1462_s21 = smov %s1177_s22 }
 0x250   : > { %s1463_s22 = smov %s1181_s23  ;;  %s1464_s23 = smov %s1296_s11 }
 0x251   : > { %s1465_s24 = smov %s1189_s25  ;;  %25 = sbr.rel (!%p23_p13) target bundleno = 10 (0xa), region = 120 }
 0x254   : > { %s1466_s25 = smov %s1461_s10 }
 0x256   :  { %768 = vsyncpa [#allocation3], 1 }
 0x257   :  { %770 = vsyncpa [#allocation3 + $0x1], 1 }
 0x258   :  { %771 = vsyncpa [#allocation4], 1 }
 0x259   :  { %773 = vsyncpa [#allocation4 + $0x1], 1 }
 0x25a   :  { %774 = vsyncpa [#allocation7], 1 }
 0x25b   :  { %776 = vsyncpa [#allocation7 + $0x1], 1 }

</bundles_post_ra>
